<compile_context>
chip_gen: v6e
topology: v6e:2x2x1
jax: 0.10.0
libtpu: 0.0.40
codegen_flags: <defaults>
</compile_context>

<pallas_src>
import math
import functools

import jax
import jax.numpy as jnp
from jax import lax
from jax.experimental import pallas as pl
from jax.experimental.pallas import tpu as pltpu


# ----------------------------------------------------------------------------
# helpers
# ----------------------------------------------------------------------------
def _row_tile(m: int) -> int:
    """Largest row tile <= 256 that divides m and is sublane-aligned (mult of 8);
    falls back to the full dimension (always legal as a BlockSpec block dim)."""
    if m <= 256:
        return m
    for t in (256, 128, 64, 32, 16, 8):
        if m % t == 0:
            return t
    return m


_PAR = pltpu.CompilerParams(dimension_semantics=("parallel",))


# ----------------------------------------------------------------------------
# fused linear (+ bias, + optional ReLU) kernel: y = act(x @ w + b)
# ----------------------------------------------------------------------------
def _linear_kernel(x_ref, w_ref, b_ref, o_ref, *, activation):
    y = jnp.dot(x_ref[...], w_ref[...], preferred_element_type=jnp.float32)
    y = y + b_ref[...]                       # (1, N) broadcast over rows
    if activation == "relu":
        y = jnp.maximum(y, 0.0)
    o_ref[...] = y.astype(o_ref.dtype)


def linear_pallas(x, w, b, activation=None):
    """x: [M, K], w: [K, N], b: [N]  ->  [M, N].  Weights stay VMEM-resident
    across the row-tiled grid (index_map returns the same block every step)."""
    M, K = x.shape
    N = w.shape[1]
    tm = _row_tile(M)
    kernel = functools.partial(_linear_kernel, activation=activation)
    return pl.pallas_call(
        kernel,
        out_shape=jax.ShapeDtypeStruct((M, N), x.dtype),
        grid=(M // tm,),
        in_specs=[
            pl.BlockSpec((tm, K), lambda i: (i, 0)),
            pl.BlockSpec((K, N), lambda i: (0, 0)),
            pl.BlockSpec((1, N), lambda i: (0, 0)),
        ],
        out_specs=pl.BlockSpec((tm, N), lambda i: (i, 0)),
        compiler_params=_PAR,
    )(x, w, b.reshape(1, N))


# ----------------------------------------------------------------------------
# per-(batch*head) scaled-dot-product attention kernel
# ----------------------------------------------------------------------------
def _attn_kernel(q_ref, k_ref, v_ref, o_ref, *, scale):
    q = q_ref[0]                              # (S, Dh)
    k = k_ref[0]
    v = v_ref[0]
    # scores = q @ k^T  (contract last dims; no explicit transpose relayout)
    s = lax.dot_general(q, k, (((1,), (1,)), ((), ())),
                        preferred_element_type=jnp.float32) * scale
    m = jnp.max(s, axis=-1, keepdims=True)
    p = jnp.exp(s - m)
    p = p / jnp.sum(p, axis=-1, keepdims=True)
    o = jnp.dot(p.astype(v.dtype), v, preferred_element_type=jnp.float32)
    o_ref[0] = o.astype(o_ref.dtype)


def attention_pallas(q, k, v):
    """q, k, v: [B*H, S, Dh] -> [B*H, S, Dh]."""
    BH, S, Dh = q.shape
    kernel = functools.partial(_attn_kernel, scale=1.0 / math.sqrt(Dh))
    spec = pl.BlockSpec((1, S, Dh), lambda i: (i, 0, 0))
    return pl.pallas_call(
        kernel,
        out_shape=jax.ShapeDtypeStruct((BH, S, Dh), q.dtype),
        grid=(BH,),
        in_specs=[spec, spec, spec],
        out_specs=spec,
        compiler_params=_PAR,
    )(q, k, v)


# ----------------------------------------------------------------------------
# fused residual-add + LayerNorm kernel: out = LN(x + y) * gamma + beta
# ----------------------------------------------------------------------------
def _add_ln_kernel(x_ref, y_ref, g_ref, b_ref, o_ref, *, eps):
    z = x_ref[...].astype(jnp.float32) + y_ref[...].astype(jnp.float32)
    mean = jnp.mean(z, axis=-1, keepdims=True)
    zc = z - mean
    var = jnp.mean(zc * zc, axis=-1, keepdims=True)      # biased, like torch
    o = zc * lax.rsqrt(var + eps) * g_ref[...] + b_ref[...]
    o_ref[...] = o.astype(o_ref.dtype)


def add_layernorm_pallas(x, y, gamma, beta, eps):
    M, D = x.shape
    tm = _row_tile(M)
    kernel = functools.partial(_add_ln_kernel, eps=eps)
    return pl.pallas_call(
        kernel,
        out_shape=jax.ShapeDtypeStruct((M, D), x.dtype),
        grid=(M // tm,),
        in_specs=[
            pl.BlockSpec((tm, D), lambda i: (i, 0)),
            pl.BlockSpec((tm, D), lambda i: (i, 0)),
            pl.BlockSpec((1, D), lambda i: (0, 0)),
            pl.BlockSpec((1, D), lambda i: (0, 0)),
        ],
        out_specs=pl.BlockSpec((tm, D), lambda i: (i, 0)),
        compiler_params=_PAR,
    )(x, y, gamma.reshape(1, D), beta.reshape(1, D))


# ----------------------------------------------------------------------------
# fused final_linear + concat kernel: out = [x @ w + b , cat]
# ----------------------------------------------------------------------------
def _final_concat_kernel(x_ref, w_ref, b_ref, c_ref, o_ref):
    y = jnp.dot(x_ref[...], w_ref[...], preferred_element_type=jnp.float32)
    y = y + b_ref[...]
    o_ref[...] = jnp.concatenate(
        [y.astype(o_ref.dtype), c_ref[...].astype(o_ref.dtype)], axis=-1)


def final_linear_concat_pallas(x, w, b, cat2d):
    M, D = x.shape
    D2 = w.shape[1]
    Ccat = cat2d.shape[1]
    tm = _row_tile(M)
    return pl.pallas_call(
        _final_concat_kernel,
        out_shape=jax.ShapeDtypeStruct((M, D2 + Ccat), x.dtype),
        grid=(M // tm,),
        in_specs=[
            pl.BlockSpec((tm, D), lambda i: (i, 0)),
            pl.BlockSpec((D, D2), lambda i: (0, 0)),
            pl.BlockSpec((1, D2), lambda i: (0, 0)),
            pl.BlockSpec((tm, Ccat), lambda i: (i, 0)),
        ],
        out_specs=pl.BlockSpec((tm, D2 + Ccat), lambda i: (i, 0)),
        compiler_params=_PAR,
    )(x, w, b.reshape(1, D2), cat2d)


# ----------------------------------------------------------------------------
# full layer forward (eval mode)
# ----------------------------------------------------------------------------
def transformer_encoder_layer(src, cat, params, *, nhead, eps=1e-5):
    """src: [S, B, d_model]   cat: [S, B, C_cat]   ->   [S, B, d_model//2 + C_cat]."""
    S, B, D = src.shape
    H = nhead
    Dh = D // H
    N = S * B
    x2d = src.reshape(N, D)                       # lane-dense [tokens, features]
    cat2d = cat.reshape(N, -1)

    # ---- self-attention block -------------------------------------------------
    qkv = linear_pallas(x2d, params["w_qkv"], params["b_qkv"])      # [N, 3D]
    qkv = qkv.reshape(S, B, 3, H, Dh)
    q = qkv[:, :, 0].transpose(1, 2, 0, 3).reshape(B * H, S, Dh)
    k = qkv[:, :, 1].transpose(1, 2, 0, 3).reshape(B * H, S, Dh)
    v = qkv[:, :, 2].transpose(1, 2, 0, 3).reshape(B * H, S, Dh)
    o = attention_pallas(q, k, v)                                   # [B*H, S, Dh]
    o = o.reshape(B, H, S, Dh).transpose(2, 0, 1, 3).reshape(N, D)
    sa = linear_pallas(o, params["w_o"], params["b_o"])             # out_proj

    # ---- norm1(src + sa) --------------------------------------------------------
    x = add_layernorm_pallas(x2d, sa, params["ln1_g"], params["ln1_b"], eps)

    # ---- feed-forward block (cat is ignored, matching _ff_block) ---------------
    h = linear_pallas(x, params["w_ff1"], params["b_ff1"], activation="relu")
    ff = linear_pallas(h, params["w_ff2"], params["b_ff2"])

    # ---- norm2(x + ff) ----------------------------------------------------------
    x = add_layernorm_pallas(x, ff, params["ln2_g"], params["ln2_b"], eps)

    # ---- final_linear + concat --------------------------------------------------
    out2d = final_linear_concat_pallas(x, params["w_fin"], params["b_fin"], cat2d)
    return out2d.reshape(S, B, -1)


# ----------------------------------------------------------------------------
# pure-JAX reference (same math as the PyTorch module in eval mode)
# ----------------------------------------------------------------------------
def reference_forward(src, cat, params, *, nhead, eps=1e-5):
    S, B, D = src.shape
    H, Dh, N = nhead, D // nhead, S * B
    x = src.reshape(N, D)
    qkv = (x @ params["w_qkv"] + params["b_qkv"]).reshape(S, B, 3, H, Dh)
    q = qkv[:, :, 0].transpose(1, 2, 0, 3).reshape(B * H, S, Dh)
    k = qkv[:, :, 1].transpose(1, 2, 0, 3).reshape(B * H, S, Dh)
    v = qkv[:, :, 2].transpose(1, 2, 0, 3).reshape(B * H, S, Dh)
    s = jnp.einsum("bqd,bkd->bqk", q, k) / math.sqrt(Dh)
    p = jax.nn.softmax(s, axis=-1)
    o = jnp.einsum("bqk,bkd->bqd", p, v)
    o = o.reshape(B, H, S, Dh).transpose(2, 0, 1, 3).reshape(N, D)
    sa = o @ params["w_o"] + params["b_o"]

    def ln(z, g, b):
        m = z.mean(-1, keepdims=True)
        va = ((z - m) ** 2).mean(-1, keepdims=True)
        return (z - m) / jnp.sqrt(va + eps) * g + b

    x1 = ln(x + sa, params["ln1_g"], params["ln1_b"])
    hh = jnp.maximum(x1 @ params["w_ff1"] + params["b_ff1"], 0.0)
    ff = hh @ params["w_ff2"] + params["b_ff2"]
    x2 = ln(x1 + ff, params["ln2_g"], params["ln2_b"])
    z = x2 @ params["w_fin"] + params["b_fin"]
    return jnp.concatenate([z, cat.reshape(N, -1)], axis=-1).reshape(S, B, -1)


# ----------------------------------------------------------------------------
if __name__ == "__main__":
    S, B, D = 8, 2, 32          # seq, batch, d_model
    H = 4                       # nhead
    F = 64                      # dim_feedforward (small for the test)
    CCAT = 16                   # feature width of `cat`
    EPS = 1e-5

    key = jax.random.PRNGKey(0)
    ks = jax.random.split(key, 16)

    def rnd(k, shape, scale=0.1):
        return jax.random.normal(k, shape, dtype=jnp.float32) * scale

    params = {
        # weights stored as [in, out] (transposed vs. torch's [out, in])
        "w_qkv": rnd(ks[0], (D, 3 * D)), "b_qkv": rnd(ks[1], (3 * D,)),
        "w_o":   rnd(ks[2], (D, D)),     "b_o":   rnd(ks[3], (D,)),
        "ln1_g": 1.0 + rnd(ks[4], (D,)), "ln1_b": rnd(ks[5], (D,)),
        "w_ff1": rnd(ks[6], (D, F)),     "b_ff1": rnd(ks[7], (F,)),
        "w_ff2": rnd(ks[8], (F, D)),     "b_ff2": rnd(ks[9], (D,)),
        "ln2_g": 1.0 + rnd(ks[10], (D,)), "ln2_b": rnd(ks[11], (D,)),
        "w_fin": rnd(ks[12], (D, D // 2)), "b_fin": rnd(ks[13], (D // 2,)),
    }
    src = jax.random.normal(ks[14], (S, B, D), dtype=jnp.float32)
    cat = jax.random.normal(ks[15], (S, B, CCAT), dtype=jnp.float32)

    fwd = jax.jit(functools.partial(transformer_encoder_layer, nhead=H, eps=EPS))
    out = jax.block_until_ready(fwd(src, cat, params))

    ref = reference_forward(src, cat, params, nhead=H, eps=EPS)
    assert out.shape == (S, B, D // 2 + CCAT), out.shape
    err = float(jnp.max(jnp.abs(out - ref)))
    assert jnp.allclose(out, ref, atol=1e-4, rtol=1e-4), f"max abs err {err}"

    print("KERNEL_OK")
</pallas_src>

<mosaic_0001>
module attributes {stable_mosaic.version = 11 : i64} {
  func.func @_linear_kernel(%arg0: i32, %arg1: memref<16x32xf32, #tpu.memory_space<vmem>>, %arg2: memref<32x96xf32, #tpu.memory_space<vmem>>, %arg3: memref<1x96xf32, #tpu.memory_space<vmem>>, %arg4: memref<16x96xf32, #tpu.memory_space<vmem>>) attributes {dimension_semantics = [#tpu.dimension_semantics<parallel>], iteration_bounds = array<i64: 1>, scalar_prefetch = 0 : i64, scratch_operands = 0 : i64, tpu.core_type = #tpu.core_type<tc>, window_params = [{transform_indices = @transform_0, window_bounds = array<i64: 16, 32>}, {pipeline_mode = #tpu.pipeline_mode<synchronous>, transform_indices = @transform_1, window_bounds = array<i64: 32, 96>}, {pipeline_mode = #tpu.pipeline_mode<synchronous>, transform_indices = @transform_2, window_bounds = array<i64: 1, 96>}, {transform_indices = @transform_3, window_bounds = array<i64: 16, 96>}]} {
    %c0 = arith.constant 0 : index
    %c0_0 = arith.constant 0 : index
    %0 = vector.load %arg1[%c0, %c0_0] : memref<16x32xf32, #tpu.memory_space<vmem>>, vector<16x32xf32>
    %c0_1 = arith.constant 0 : index
    %c0_2 = arith.constant 0 : index
    %1 = vector.load %arg2[%c0_1, %c0_2] : memref<32x96xf32, #tpu.memory_space<vmem>>, vector<32x96xf32>
    %cst = arith.constant dense<0.000000e+00> : vector<16x96xf32>
    %2 = tpu.matmul %0, %1, %cst {dimension_numbers = #tpu.dot_dimension_numbers<[1], [0], [0], [1], [0, 0, 1, 1], [], []>} : vector<16x32xf32>, vector<32x96xf32>, vector<16x96xf32> -> vector<16x96xf32>
    %c0_3 = arith.constant 0 : index
    %c0_4 = arith.constant 0 : index
    %3 = vector.load %arg3[%c0_3, %c0_4] : memref<1x96xf32, #tpu.memory_space<vmem>>, vector<1x96xf32>
    %4 = vector.broadcast %3 : vector<1x96xf32> to vector<16x96xf32>
    %5 = arith.addf %2, %4 : vector<16x96xf32>
    %c0_5 = arith.constant 0 : index
    %c0_6 = arith.constant 0 : index
    %6 = vector.load %arg4[%c0_5, %c0_6] : memref<16x96xf32, #tpu.memory_space<vmem>>, vector<16x96xf32>
    tpu.vector_store %arg4[%c0_5, %c0_6], %5 {strides = array<i32>} : memref<16x96xf32, #tpu.memory_space<vmem>>, vector<16x96xf32>,
    return
  }
  func.func @transform_0(%arg0: i32) -> (i32, i32) {
    %c0_i32 = arith.constant 0 : i32
    %c0_i32_0 = arith.constant 0 : i32
    return %arg0, %c0_i32 : i32, i32
  }
  func.func @transform_1(%arg0: i32) -> (i32, i32) {
    %c0_i32 = arith.constant 0 : i32
    %c0_i32_0 = arith.constant 0 : i32
    %c0_i32_1 = arith.constant 0 : i32
    return %c0_i32, %c0_i32_0 : i32, i32
  }
  func.func @transform_2(%arg0: i32) -> (i32, i32) {
    %c0_i32 = arith.constant 0 : i32
    %c0_i32_0 = arith.constant 0 : i32
    %c0_i32_1 = arith.constant 0 : i32
    return %c0_i32, %c0_i32_0 : i32, i32
  }
  func.func @transform_3(%arg0: i32) -> (i32, i32) {
    %c0_i32 = arith.constant 0 : i32
    %c0_i32_0 = arith.constant 0 : i32
    return %arg0, %c0_i32 : i32, i32
  }
}

module attributes {stable_mosaic.version = 11 : i64} {
  func.func @_attn_kernel(%arg0: i32, %arg1: memref<1x8x8xf32, #tpu.memory_space<vmem>>, %arg2: memref<1x8x8xf32, #tpu.memory_space<vmem>>, %arg3: memref<1x8x8xf32, #tpu.memory_space<vmem>>, %arg4: memref<1x8x8xf32, #tpu.memory_space<vmem>>) attributes {dimension_semantics = [#tpu.dimension_semantics<parallel>], iteration_bounds = array<i64: 8>, scalar_prefetch = 0 : i64, scratch_operands = 0 : i64, tpu.core_type = #tpu.core_type<tc>, window_params = [{transform_indices = @transform_0, window_bounds = array<i64: 1, 8, 8>}, {transform_indices = @transform_1, window_bounds = array<i64: 1, 8, 8>}, {transform_indices = @transform_2, window_bounds = array<i64: 1, 8, 8>}, {transform_indices = @transform_3, window_bounds = array<i64: 1, 8, 8>}]} {
    %c0 = arith.constant 0 : index
    %c0_0 = arith.constant 0 : index
    %c0_1 = arith.constant 0 : index
    %0 = vector.load %arg1[%c0, %c0_0, %c0_1] : memref<1x8x8xf32, #tpu.memory_space<vmem>>, vector<1x8x8xf32>
    %1 = vector.shape_cast %0 : vector<1x8x8xf32> to vector<8x8xf32>
    %c0_2 = arith.constant 0 : index
    %c0_3 = arith.constant 0 : index
    %c0_4 = arith.constant 0 : index
    %2 = vector.load %arg2[%c0_2, %c0_3, %c0_4] : memref<1x8x8xf32, #tpu.memory_space<vmem>>, vector<1x8x8xf32>
    %3 = vector.shape_cast %2 : vector<1x8x8xf32> to vector<8x8xf32>
    %c0_5 = arith.constant 0 : index
    %c0_6 = arith.constant 0 : index
    %c0_7 = arith.constant 0 : index
    %4 = vector.load %arg3[%c0_5, %c0_6, %c0_7] : memref<1x8x8xf32, #tpu.memory_space<vmem>>, vector<1x8x8xf32>
    %5 = vector.shape_cast %4 : vector<1x8x8xf32> to vector<8x8xf32>
    %cst = arith.constant dense<0.000000e+00> : vector<8x8xf32>
    %6 = tpu.matmul %1, %3, %cst {dimension_numbers = #tpu.dot_dimension_numbers<[1], [1], [0], [0], [0, 0, 1, 0], [], []>} : vector<8x8xf32>, vector<8x8xf32>, vector<8x8xf32> -> vector<8x8xf32>
    %cst_8 = arith.constant 0.353553385 : f32
    %7 = vector.broadcast %cst_8 : f32 to vector<8x8xf32>
    %8 = arith.mulf %6, %7 : vector<8x8xf32>
    %cst_9 = arith.constant dense<0xFF800000> : vector<8xf32>
    %9 = vector.multi_reduction <maximumf>, %8, %cst_9 [1] : vector<8x8xf32> to vector<8xf32>
    %10 = vector.shape_cast %9 : vector<8xf32> to vector<8x1xf32>
    %11 = vector.broadcast %10 : vector<8x1xf32> to vector<8x8xf32>
    %12 = arith.subf %8, %11 : vector<8x8xf32>
    %13 = math.exp %12 : vector<8x8xf32>
    %cst_10 = arith.constant dense<0.000000e+00> : vector<8xf32>
    %14 = vector.multi_reduction <add>, %13, %cst_10 [1] : vector<8x8xf32> to vector<8xf32>
    %15 = vector.shape_cast %14 : vector<8xf32> to vector<8x1xf32>
    %16 = vector.broadcast %15 : vector<8x1xf32> to vector<8x8xf32>
    %17 = arith.divf %13, %16 : vector<8x8xf32>
    %cst_11 = arith.constant dense<0.000000e+00> : vector<8x8xf32>
    %18 = tpu.matmul %17, %5, %cst_11 {dimension_numbers = #tpu.dot_dimension_numbers<[1], [0], [0], [1], [0, 0, 1, 1], [], []>} : vector<8x8xf32>, vector<8x8xf32>, vector<8x8xf32> -> vector<8x8xf32>
    %c0_12 = arith.constant 0 : index
    %c0_13 = arith.constant 0 : index
    %c0_14 = arith.constant 0 : index
    %19 = vector.load %arg4[%c0_12, %c0_13, %c0_14] : memref<1x8x8xf32, #tpu.memory_space<vmem>>, vector<1x8x8xf32>
    %20 = vector.shape_cast %19 : vector<1x8x8xf32> to vector<8x8xf32>
    %21 = vector.shape_cast %18 : vector<8x8xf32> to vector<1x8x8xf32>
    tpu.vector_store %arg4[%c0_12, %c0_13, %c0_14], %21 {strides = array<i32>} : memref<1x8x8xf32, #tpu.memory_space<vmem>>, vector<1x8x8xf32>,
    return
  }
  func.func @transform_0(%arg0: i32) -> (i32, i32, i32) {
    %c0_i32 = arith.constant 0 : i32
    %c0_i32_0 = arith.constant 0 : i32
    %c0_i32_1 = arith.constant 0 : i32
    return %arg0, %c0_i32, %c0_i32_0 : i32, i32, i32
  }
  func.func @transform_1(%arg0: i32) -> (i32, i32, i32) {
    %c0_i32 = arith.constant 0 : i32
    %c0_i32_0 = arith.constant 0 : i32
    %c0_i32_1 = arith.constant 0 : i32
    return %arg0, %c0_i32, %c0_i32_0 : i32, i32, i32
  }
  func.func @transform_2(%arg0: i32) -> (i32, i32, i32) {
    %c0_i32 = arith.constant 0 : i32
    %c0_i32_0 = arith.constant 0 : i32
    %c0_i32_1 = arith.constant 0 : i32
    return %arg0, %c0_i32, %c0_i32_0 : i32, i32, i32
  }
  func.func @transform_3(%arg0: i32) -> (i32, i32, i32) {
    %c0_i32 = arith.constant 0 : i32
    %c0_i32_0 = arith.constant 0 : i32
    %c0_i32_1 = arith.constant 0 : i32
    return %arg0, %c0_i32, %c0_i32_0 : i32, i32, i32
  }
}

module attributes {stable_mosaic.version = 11 : i64} {
  func.func @_linear_kernel(%arg0: i32, %arg1: memref<16x32xf32, #tpu.memory_space<vmem>>, %arg2: memref<32x32xf32, #tpu.memory_space<vmem>>, %arg3: memref<1x32xf32, #tpu.memory_space<vmem>>, %arg4: memref<16x32xf32, #tpu.memory_space<vmem>>) attributes {dimension_semantics = [#tpu.dimension_semantics<parallel>], iteration_bounds = array<i64: 1>, scalar_prefetch = 0 : i64, scratch_operands = 0 : i64, tpu.core_type = #tpu.core_type<tc>, window_params = [{transform_indices = @transform_0, window_bounds = array<i64: 16, 32>}, {pipeline_mode = #tpu.pipeline_mode<synchronous>, transform_indices = @transform_1, window_bounds = array<i64: 32, 32>}, {pipeline_mode = #tpu.pipeline_mode<synchronous>, transform_indices = @transform_2, window_bounds = array<i64: 1, 32>}, {transform_indices = @transform_3, window_bounds = array<i64: 16, 32>}]} {
    %c0 = arith.constant 0 : index
    %c0_0 = arith.constant 0 : index
    %0 = vector.load %arg1[%c0, %c0_0] : memref<16x32xf32, #tpu.memory_space<vmem>>, vector<16x32xf32>
    %c0_1 = arith.constant 0 : index
    %c0_2 = arith.constant 0 : index
    %1 = vector.load %arg2[%c0_1, %c0_2] : memref<32x32xf32, #tpu.memory_space<vmem>>, vector<32x32xf32>
    %cst = arith.constant dense<0.000000e+00> : vector<16x32xf32>
    %2 = tpu.matmul %0, %1, %cst {dimension_numbers = #tpu.dot_dimension_numbers<[1], [0], [0], [1], [0, 0, 1, 1], [], []>} : vector<16x32xf32>, vector<32x32xf32>, vector<16x32xf32> -> vector<16x32xf32>
    %c0_3 = arith.constant 0 : index
    %c0_4 = arith.constant 0 : index
    %3 = vector.load %arg3[%c0_3, %c0_4] : memref<1x32xf32, #tpu.memory_space<vmem>>, vector<1x32xf32>
    %4 = vector.broadcast %3 : vector<1x32xf32> to vector<16x32xf32>
    %5 = arith.addf %2, %4 : vector<16x32xf32>
    %c0_5 = arith.constant 0 : index
    %c0_6 = arith.constant 0 : index
    %6 = vector.load %arg4[%c0_5, %c0_6] : memref<16x32xf32, #tpu.memory_space<vmem>>, vector<16x32xf32>
    tpu.vector_store %arg4[%c0_5, %c0_6], %5 {strides = array<i32>} : memref<16x32xf32, #tpu.memory_space<vmem>>, vector<16x32xf32>,
    return
  }
  func.func @transform_0(%arg0: i32) -> (i32, i32) {
    %c0_i32 = arith.constant 0 : i32
    %c0_i32_0 = arith.constant 0 : i32
    return %arg0, %c0_i32 : i32, i32
  }
  func.func @transform_1(%arg0: i32) -> (i32, i32) {
    %c0_i32 = arith.constant 0 : i32
    %c0_i32_0 = arith.constant 0 : i32
    %c0_i32_1 = arith.constant 0 : i32
    return %c0_i32, %c0_i32_0 : i32, i32
  }
  func.func @transform_2(%arg0: i32) -> (i32, i32) {
    %c0_i32 = arith.constant 0 : i32
    %c0_i32_0 = arith.constant 0 : i32
    %c0_i32_1 = arith.constant 0 : i32
    return %c0_i32, %c0_i32_0 : i32, i32
  }
  func.func @transform_3(%arg0: i32) -> (i32, i32) {
    %c0_i32 = arith.constant 0 : i32
    %c0_i32_0 = arith.constant 0 : i32
    return %arg0, %c0_i32 : i32, i32
  }
}

module attributes {stable_mosaic.version = 11 : i64} {
  func.func @_add_ln_kernel(%arg0: i32, %arg1: memref<16x32xf32, #tpu.memory_space<vmem>>, %arg2: memref<16x32xf32, #tpu.memory_space<vmem>>, %arg3: memref<1x32xf32, #tpu.memory_space<vmem>>, %arg4: memref<1x32xf32, #tpu.memory_space<vmem>>, %arg5: memref<16x32xf32, #tpu.memory_space<vmem>>) attributes {dimension_semantics = [#tpu.dimension_semantics<parallel>], iteration_bounds = array<i64: 1>, scalar_prefetch = 0 : i64, scratch_operands = 0 : i64, tpu.core_type = #tpu.core_type<tc>, window_params = [{transform_indices = @transform_0, window_bounds = array<i64: 16, 32>}, {transform_indices = @transform_1, window_bounds = array<i64: 16, 32>}, {pipeline_mode = #tpu.pipeline_mode<synchronous>, transform_indices = @transform_2, window_bounds = array<i64: 1, 32>}, {pipeline_mode = #tpu.pipeline_mode<synchronous>, transform_indices = @transform_3, window_bounds = array<i64: 1, 32>}, {transform_indices = @transform_4, window_bounds = array<i64: 16, 32>}]} {
    %c0 = arith.constant 0 : index
    %c0_0 = arith.constant 0 : index
    %0 = vector.load %arg1[%c0, %c0_0] : memref<16x32xf32, #tpu.memory_space<vmem>>, vector<16x32xf32>
    %c0_1 = arith.constant 0 : index
    %c0_2 = arith.constant 0 : index
    %1 = vector.load %arg2[%c0_1, %c0_2] : memref<16x32xf32, #tpu.memory_space<vmem>>, vector<16x32xf32>
    %2 = arith.addf %0, %1 : vector<16x32xf32>
    %cst = arith.constant dense<0.000000e+00> : vector<16xf32>
    %3 = vector.multi_reduction <add>, %2, %cst [1] : vector<16x32xf32> to vector<16xf32>
    %4 = vector.shape_cast %3 : vector<16xf32> to vector<16x1xf32>
    %cst_3 = arith.constant 3.200000e+01 : f32
    %5 = vector.broadcast %cst_3 : f32 to vector<16x1xf32>
    %6 = arith.divf %4, %5 : vector<16x1xf32>
    %7 = vector.broadcast %6 : vector<16x1xf32> to vector<16x32xf32>
    %8 = arith.subf %2, %7 : vector<16x32xf32>
    %9 = arith.mulf %8, %8 : vector<16x32xf32>
    %cst_4 = arith.constant dense<0.000000e+00> : vector<16xf32>
    %10 = vector.multi_reduction <add>, %9, %cst_4 [1] : vector<16x32xf32> to vector<16xf32>
    %11 = vector.shape_cast %10 : vector<16xf32> to vector<16x1xf32>
    %cst_5 = arith.constant 3.200000e+01 : f32
    %12 = vector.broadcast %cst_5 : f32 to vector<16x1xf32>
    %13 = arith.divf %11, %12 : vector<16x1xf32>
    %cst_6 = arith.constant 9.99999974E-6 : f32
    %14 = vector.broadcast %cst_6 : f32 to vector<16x1xf32>
    %15 = arith.addf %13, %14 : vector<16x1xf32>
    %16 = math.rsqrt %15 : vector<16x1xf32>
    %17 = vector.broadcast %16 : vector<16x1xf32> to vector<16x32xf32>
    %18 = arith.mulf %8, %17 : vector<16x32xf32>
    %c0_7 = arith.constant 0 : index
    %c0_8 = arith.constant 0 : index
    %19 = vector.load %arg3[%c0_7, %c0_8] : memref<1x32xf32, #tpu.memory_space<vmem>>, vector<1x32xf32>
    %20 = vector.broadcast %19 : vector<1x32xf32> to vector<16x32xf32>
    %21 = arith.mulf %18, %20 : vector<16x32xf32>
    %c0_9 = arith.constant 0 : index
    %c0_10 = arith.constant 0 : index
    %22 = vector.load %arg4[%c0_9, %c0_10] : memref<1x32xf32, #tpu.memory_space<vmem>>, vector<1x32xf32>
    %23 = vector.broadcast %22 : vector<1x32xf32> to vector<16x32xf32>
    %24 = arith.addf %21, %23 : vector<16x32xf32>
    %c0_11 = arith.constant 0 : index
    %c0_12 = arith.constant 0 : index
    %25 = vector.load %arg5[%c0_11, %c0_12] : memref<16x32xf32, #tpu.memory_space<vmem>>, vector<16x32xf32>
    tpu.vector_store %arg5[%c0_11, %c0_12], %24 {strides = array<i32>} : memref<16x32xf32, #tpu.memory_space<vmem>>, vector<16x32xf32>,
    return
  }
  func.func @transform_0(%arg0: i32) -> (i32, i32) {
    %c0_i32 = arith.constant 0 : i32
    %c0_i32_0 = arith.constant 0 : i32
    return %arg0, %c0_i32 : i32, i32
  }
  func.func @transform_1(%arg0: i32) -> (i32, i32) {
    %c0_i32 = arith.constant 0 : i32
    %c0_i32_0 = arith.constant 0 : i32
    return %arg0, %c0_i32 : i32, i32
  }
  func.func @transform_2(%arg0: i32) -> (i32, i32) {
    %c0_i32 = arith.constant 0 : i32
    %c0_i32_0 = arith.constant 0 : i32
    %c0_i32_1 = arith.constant 0 : i32
    return %c0_i32, %c0_i32_0 : i32, i32
  }
  func.func @transform_3(%arg0: i32) -> (i32, i32) {
    %c0_i32 = arith.constant 0 : i32
    %c0_i32_0 = arith.constant 0 : i32
    %c0_i32_1 = arith.constant 0 : i32
    return %c0_i32, %c0_i32_0 : i32, i32
  }
  func.func @transform_4(%arg0: i32) -> (i32, i32) {
    %c0_i32 = arith.constant 0 : i32
    %c0_i32_0 = arith.constant 0 : i32
    return %arg0, %c0_i32 : i32, i32
  }
}

module attributes {stable_mosaic.version = 11 : i64} {
  func.func @_linear_kernel(%arg0: i32, %arg1: memref<16x32xf32, #tpu.memory_space<vmem>>, %arg2: memref<32x64xf32, #tpu.memory_space<vmem>>, %arg3: memref<1x64xf32, #tpu.memory_space<vmem>>, %arg4: memref<16x64xf32, #tpu.memory_space<vmem>>) attributes {dimension_semantics = [#tpu.dimension_semantics<parallel>], iteration_bounds = array<i64: 1>, scalar_prefetch = 0 : i64, scratch_operands = 0 : i64, tpu.core_type = #tpu.core_type<tc>, window_params = [{transform_indices = @transform_0, window_bounds = array<i64: 16, 32>}, {pipeline_mode = #tpu.pipeline_mode<synchronous>, transform_indices = @transform_1, window_bounds = array<i64: 32, 64>}, {pipeline_mode = #tpu.pipeline_mode<synchronous>, transform_indices = @transform_2, window_bounds = array<i64: 1, 64>}, {transform_indices = @transform_3, window_bounds = array<i64: 16, 64>}]} {
    %c0 = arith.constant 0 : index
    %c0_0 = arith.constant 0 : index
    %0 = vector.load %arg1[%c0, %c0_0] : memref<16x32xf32, #tpu.memory_space<vmem>>, vector<16x32xf32>
    %c0_1 = arith.constant 0 : index
    %c0_2 = arith.constant 0 : index
    %1 = vector.load %arg2[%c0_1, %c0_2] : memref<32x64xf32, #tpu.memory_space<vmem>>, vector<32x64xf32>
    %cst = arith.constant dense<0.000000e+00> : vector<16x64xf32>
    %2 = tpu.matmul %0, %1, %cst {dimension_numbers = #tpu.dot_dimension_numbers<[1], [0], [0], [1], [0, 0, 1, 1], [], []>} : vector<16x32xf32>, vector<32x64xf32>, vector<16x64xf32> -> vector<16x64xf32>
    %c0_3 = arith.constant 0 : index
    %c0_4 = arith.constant 0 : index
    %3 = vector.load %arg3[%c0_3, %c0_4] : memref<1x64xf32, #tpu.memory_space<vmem>>, vector<1x64xf32>
    %4 = vector.broadcast %3 : vector<1x64xf32> to vector<16x64xf32>
    %5 = arith.addf %2, %4 : vector<16x64xf32>
    %cst_5 = arith.constant 0.000000e+00 : f32
    %6 = vector.broadcast %cst_5 : f32 to vector<16x64xf32>
    %7 = arith.maximumf %5, %6 : vector<16x64xf32>
    %c0_6 = arith.constant 0 : index
    %c0_7 = arith.constant 0 : index
    %8 = vector.load %arg4[%c0_6, %c0_7] : memref<16x64xf32, #tpu.memory_space<vmem>>, vector<16x64xf32>
    tpu.vector_store %arg4[%c0_6, %c0_7], %7 {strides = array<i32>} : memref<16x64xf32, #tpu.memory_space<vmem>>, vector<16x64xf32>,
    return
  }
  func.func @transform_0(%arg0: i32) -> (i32, i32) {
    %c0_i32 = arith.constant 0 : i32
    %c0_i32_0 = arith.constant 0 : i32
    return %arg0, %c0_i32 : i32, i32
  }
  func.func @transform_1(%arg0: i32) -> (i32, i32) {
    %c0_i32 = arith.constant 0 : i32
    %c0_i32_0 = arith.constant 0 : i32
    %c0_i32_1 = arith.constant 0 : i32
    return %c0_i32, %c0_i32_0 : i32, i32
  }
  func.func @transform_2(%arg0: i32) -> (i32, i32) {
    %c0_i32 = arith.constant 0 : i32
    %c0_i32_0 = arith.constant 0 : i32
    %c0_i32_1 = arith.constant 0 : i32
    return %c0_i32, %c0_i32_0 : i32, i32
  }
  func.func @transform_3(%arg0: i32) -> (i32, i32) {
    %c0_i32 = arith.constant 0 : i32
    %c0_i32_0 = arith.constant 0 : i32
    return %arg0, %c0_i32 : i32, i32
  }
}

module attributes {stable_mosaic.version = 11 : i64} {
  func.func @_linear_kernel(%arg0: i32, %arg1: memref<16x64xf32, #tpu.memory_space<vmem>>, %arg2: memref<64x32xf32, #tpu.memory_space<vmem>>, %arg3: memref<1x32xf32, #tpu.memory_space<vmem>>, %arg4: memref<16x32xf32, #tpu.memory_space<vmem>>) attributes {dimension_semantics = [#tpu.dimension_semantics<parallel>], iteration_bounds = array<i64: 1>, scalar_prefetch = 0 : i64, scratch_operands = 0 : i64, tpu.core_type = #tpu.core_type<tc>, window_params = [{transform_indices = @transform_0, window_bounds = array<i64: 16, 64>}, {pipeline_mode = #tpu.pipeline_mode<synchronous>, transform_indices = @transform_1, window_bounds = array<i64: 64, 32>}, {pipeline_mode = #tpu.pipeline_mode<synchronous>, transform_indices = @transform_2, window_bounds = array<i64: 1, 32>}, {transform_indices = @transform_3, window_bounds = array<i64: 16, 32>}]} {
    %c0 = arith.constant 0 : index
    %c0_0 = arith.constant 0 : index
    %0 = vector.load %arg1[%c0, %c0_0] : memref<16x64xf32, #tpu.memory_space<vmem>>, vector<16x64xf32>
    %c0_1 = arith.constant 0 : index
    %c0_2 = arith.constant 0 : index
    %1 = vector.load %arg2[%c0_1, %c0_2] : memref<64x32xf32, #tpu.memory_space<vmem>>, vector<64x32xf32>
    %cst = arith.constant dense<0.000000e+00> : vector<16x32xf32>
    %2 = tpu.matmul %0, %1, %cst {dimension_numbers = #tpu.dot_dimension_numbers<[1], [0], [0], [1], [0, 0, 1, 1], [], []>} : vector<16x64xf32>, vector<64x32xf32>, vector<16x32xf32> -> vector<16x32xf32>
    %c0_3 = arith.constant 0 : index
    %c0_4 = arith.constant 0 : index
    %3 = vector.load %arg3[%c0_3, %c0_4] : memref<1x32xf32, #tpu.memory_space<vmem>>, vector<1x32xf32>
    %4 = vector.broadcast %3 : vector<1x32xf32> to vector<16x32xf32>
    %5 = arith.addf %2, %4 : vector<16x32xf32>
    %c0_5 = arith.constant 0 : index
    %c0_6 = arith.constant 0 : index
    %6 = vector.load %arg4[%c0_5, %c0_6] : memref<16x32xf32, #tpu.memory_space<vmem>>, vector<16x32xf32>
    tpu.vector_store %arg4[%c0_5, %c0_6], %5 {strides = array<i32>} : memref<16x32xf32, #tpu.memory_space<vmem>>, vector<16x32xf32>,
    return
  }
  func.func @transform_0(%arg0: i32) -> (i32, i32) {
    %c0_i32 = arith.constant 0 : i32
    %c0_i32_0 = arith.constant 0 : i32
    return %arg0, %c0_i32 : i32, i32
  }
  func.func @transform_1(%arg0: i32) -> (i32, i32) {
    %c0_i32 = arith.constant 0 : i32
    %c0_i32_0 = arith.constant 0 : i32
    %c0_i32_1 = arith.constant 0 : i32
    return %c0_i32, %c0_i32_0 : i32, i32
  }
  func.func @transform_2(%arg0: i32) -> (i32, i32) {
    %c0_i32 = arith.constant 0 : i32
    %c0_i32_0 = arith.constant 0 : i32
    %c0_i32_1 = arith.constant 0 : i32
    return %c0_i32, %c0_i32_0 : i32, i32
  }
  func.func @transform_3(%arg0: i32) -> (i32, i32) {
    %c0_i32 = arith.constant 0 : i32
    %c0_i32_0 = arith.constant 0 : i32
    return %arg0, %c0_i32 : i32, i32
  }
}

module attributes {stable_mosaic.version = 11 : i64} {
  func.func @_final_concat_kernel(%arg0: i32, %arg1: memref<16x32xf32, #tpu.memory_space<vmem>>, %arg2: memref<32x16xf32, #tpu.memory_space<vmem>>, %arg3: memref<1x16xf32, #tpu.memory_space<vmem>>, %arg4: memref<16x16xf32, #tpu.memory_space<vmem>>, %arg5: memref<16x32xf32, #tpu.memory_space<vmem>>) attributes {dimension_semantics = [#tpu.dimension_semantics<parallel>], iteration_bounds = array<i64: 1>, scalar_prefetch = 0 : i64, scratch_operands = 0 : i64, tpu.core_type = #tpu.core_type<tc>, window_params = [{transform_indices = @transform_0, window_bounds = array<i64: 16, 32>}, {pipeline_mode = #tpu.pipeline_mode<synchronous>, transform_indices = @transform_1, window_bounds = array<i64: 32, 16>}, {pipeline_mode = #tpu.pipeline_mode<synchronous>, transform_indices = @transform_2, window_bounds = array<i64: 1, 16>}, {transform_indices = @transform_3, window_bounds = array<i64: 16, 16>}, {transform_indices = @transform_4, window_bounds = array<i64: 16, 32>}]} {
    %c0 = arith.constant 0 : index
    %c0_0 = arith.constant 0 : index
    %0 = vector.load %arg1[%c0, %c0_0] : memref<16x32xf32, #tpu.memory_space<vmem>>, vector<16x32xf32>
    %c0_1 = arith.constant 0 : index
    %c0_2 = arith.constant 0 : index
    %1 = vector.load %arg2[%c0_1, %c0_2] : memref<32x16xf32, #tpu.memory_space<vmem>>, vector<32x16xf32>
    %cst = arith.constant dense<0.000000e+00> : vector<16x16xf32>
    %2 = tpu.matmul %0, %1, %cst {dimension_numbers = #tpu.dot_dimension_numbers<[1], [0], [0], [1], [0, 0, 1, 1], [], []>} : vector<16x32xf32>, vector<32x16xf32>, vector<16x16xf32> -> vector<16x16xf32>
    %c0_3 = arith.constant 0 : index
    %c0_4 = arith.constant 0 : index
    %3 = vector.load %arg3[%c0_3, %c0_4] : memref<1x16xf32, #tpu.memory_space<vmem>>, vector<1x16xf32>
    %4 = vector.broadcast %3 : vector<1x16xf32> to vector<16x16xf32>
    %5 = arith.addf %2, %4 : vector<16x16xf32>
    %c0_5 = arith.constant 0 : index
    %c0_6 = arith.constant 0 : index
    %6 = vector.load %arg4[%c0_5, %c0_6] : memref<16x16xf32, #tpu.memory_space<vmem>>, vector<16x16xf32>
    %7 = tpu.concatenate %5, %6 in 1 : vector<16x16xf32>, vector<16x16xf32> -> vector<16x32xf32>
    %c0_7 = arith.constant 0 : index
    %c0_8 = arith.constant 0 : index
    %8 = vector.load %arg5[%c0_7, %c0_8] : memref<16x32xf32, #tpu.memory_space<vmem>>, vector<16x32xf32>
    tpu.vector_store %arg5[%c0_7, %c0_8], %7 {strides = array<i32>} : memref<16x32xf32, #tpu.memory_space<vmem>>, vector<16x32xf32>,
    return
  }
  func.func @transform_0(%arg0: i32) -> (i32, i32) {
    %c0_i32 = arith.constant 0 : i32
    %c0_i32_0 = arith.constant 0 : i32
    return %arg0, %c0_i32 : i32, i32
  }
  func.func @transform_1(%arg0: i32) -> (i32, i32) {
    %c0_i32 = arith.constant 0 : i32
    %c0_i32_0 = arith.constant 0 : i32
    %c0_i32_1 = arith.constant 0 : i32
    return %c0_i32, %c0_i32_0 : i32, i32
  }
  func.func @transform_2(%arg0: i32) -> (i32, i32) {
    %c0_i32 = arith.constant 0 : i32
    %c0_i32_0 = arith.constant 0 : i32
    %c0_i32_1 = arith.constant 0 : i32
    return %c0_i32, %c0_i32_0 : i32, i32
  }
  func.func @transform_3(%arg0: i32) -> (i32, i32) {
    %c0_i32 = arith.constant 0 : i32
    %c0_i32_0 = arith.constant 0 : i32
    return %arg0, %c0_i32 : i32, i32
  }
  func.func @transform_4(%arg0: i32) -> (i32, i32) {
    %c0_i32 = arith.constant 0 : i32
    %c0_i32_0 = arith.constant 0 : i32
    return %arg0, %c0_i32 : i32, i32
  }
}

</mosaic_0001>

<bundles_post_ra>
// kernel: transformer_encoder_layer.8
= control target key start
LH: loop header
LB: loop body
LE: loop exit
PB: predicated region body
PF: predicated region fallthrough
CT: control target
= control target key end

     0   :  { %8 = vsyncpa [#allocation3], 0  ;;  %s176_s12 = smov [#allocation2]   ;;  %s219_s0 = inlined_call_operand.vmem [shape: f32[16,32], index: 0, kind: input, shape index: {}]   ;;  %s220_s1 = inlined_call_operand.hbm [shape: f32[32,96], index: 1, kind: input, shape index: {}]   ;;  %s221_s2 = inlined_call_operand.vmem [shape: f32[1,96], index: 2, kind: input, shape index: {}]   ;;  %s222_s3 = inlined_call_operand.vmem [shape: f32[16,96], index: 3, kind: output, shape index: {}]  }
   0x1   :  { %s16_s13 = sshll.u32 %s176_s12, 4  ;;  %s17_s13 = int_to_ptr.vmem [resolvable:$true] %s16_s13 }
   0x2   :  { %s162_s14 = scalar_lea.vmem %s17_s13, 512  ;;  %p167_p1 = scmp.lt.s32.totalorder %s17_s13, %s17_s13 }
   0x3   :  { %p163_p0 = scmp.ne.s32.totalorder %s17_s13, %s162_s14  ;;  %p168_p2 = scmp.lt.s32.totalorder %s162_s14, %s162_s14 }
   0x5   :  { %p169_p3 = por %p168_p2, %p167_p1 }
   0x7   :  { %p170_p4 = pnand %p169_p3, %p163_p0 }
   0x9   :  { %173 = shalt.err (!%p170_p4)
}
   0xa   :  { %s177_s15 = smov 128   ;;  %s178_s16 = smov 8  }
   0xb   :  { %22 = dma.hbm_to_vmem [thread:$0]  %s220_s1, 512, %s17_s13, [#allocation3], %s177_s15, %s177_s15, %s178_s16  }
   0xc   :  { %174 = dma.done.wait [#allocation3], 512  }
   0xd   :  { %175 = vsyncadd [#allocation3], 4294966784  ;;  %vm41_vm0 = vcmask 261120   ;;  %v33_v0 = vld [vmem:[#allocation2 + $0x18] sm:$0xff]  ;;  %v32_v1 = vld [vmem:[#allocation2 + $0x10] sm:$0xff]  ;;  %vm123_vm1 = vcmask 785408  }
   0xe   :  { %140 = vmatprep.subr.mxu0 %v33_v0  ;;  %v28_v2 = vld [vmem:[%s219_s0] sm:$0xff]  ;;  %v31_v3 = vld [vmem:[#allocation2 + $0x8] sm:$0xff] }
   0xf   :  { %141 = vmatpush3.msra.mxu0 %v33_v0  ;;  %148 = vmatprep.mubr.msk.f32.mxu0 %vm41_vm0, %v28_v2  ;;  %v30_v4 = vld [vmem:[#allocation2] sm:$0xff]  ;;  %v29_v5 = vld [vmem:[%s219_s0 + $0x8] sm:$0xff] }
  0x10   :  { %142 = vmatprep.subr.mxu0 %v32_v1  ;;  %v131_v6 = vld [vmem:[%s221_s2] ss:$0 sm:$0xff] }
  0x11   :  { %143 = vmatpush3.msra.mxu0 %v32_v1 }
  0x12   :  { %144 = vmatprep.subr.mxu0 %v31_v3 }
  0x13   :  { %145 = vmatpush3.msra.mxu0 %v31_v3 }
  0x14   :  { %146 = vmatprep.subr.mxu0 %v30_v4 }
  0x15   :  { %147 = vmatpush3.msra.mxu0 %v30_v4 }
  0x16   :  { %149 = vmatmul.mubr.msk.f32.vlgmr.msra.gmra.mxu0 %vm41_vm0, %v29_v5 }
  0xd6   :  { %v150_v7 = vpop.f32.mrf.mxu0 }
  0xd7   :  { %v120_v8 = vadd.f32 %v150_v7, %v131_v6 }
  0xd8   :  { %v114_v9 = vpop.f32.mrf.mxu0 }
  0xd9   :  { %125 = vst.msk [vmem:[%s222_s3 + $0x8] sm:$0xff] %vm123_vm1, %v120_v8  ;;  %v115_v10 = vadd.f32 %v131_v6, %v114_v9 }
  0xdb   :  { %124 = vst.msk [vmem:[%s222_s3] sm:$0xff] %vm123_vm1, %v115_v10 }
  0xdc   :  { %130 = vsyncpa [#allocation3], 1 }

// kernel: transformer_encoder_layer.10
= control target key start
LH: loop header
LB: loop body
LE: loop exit
PB: predicated region body
PF: predicated region fallthrough
CT: control target
= control target key end

     0   :  { %vm27_vm0 = vcmask 261120   ;;  %s186_s1 = inlined_call_operand.vmem [shape: f32[32,32], index: 1, kind: input, shape index: {}]   ;;  %s187_s0 = inlined_call_operand.vmem [shape: f32[16,32], index: 0, kind: input, shape index: {}]   ;;  %s188_s2 = inlined_call_operand.vmem [shape: f32[1,32], index: 2, kind: input, shape index: {}]   ;;  %s189_s3 = inlined_call_operand.vmem [shape: f32[16,32], index: 3, kind: output, shape index: {}]  }
   0x1   :  { %v19_v0 = vld [vmem:[%s186_s1 + $0x18] sm:$0xff]  ;;  %v18_v1 = vld [vmem:[%s186_s1 + $0x10] sm:$0xff]  ;;  %v14_v2 = vld [vmem:[%s187_s0] sm:$0xff] }
   0x2   :  { %124 = vmatprep.subr.mxu0 %v19_v0  ;;  %v17_v3 = vld [vmem:[%s186_s1 + $0x8] sm:$0xff]  ;;  %132 = vmatprep.mubr.msk.f32.mxu0 %vm27_vm0, %v14_v2  ;;  %v16_v4 = vld [vmem:[%s186_s1] sm:$0xff] }
   0x3   :  { %125 = vmatpush3.msra.mxu0 %v19_v0  ;;  %v15_v5 = vld [vmem:[%s187_s0 + $0x8] sm:$0xff]  ;;  %v115_v6 = vld [vmem:[%s188_s2] ss:$0 sm:$0xff] }
   0x4   :  { %126 = vmatprep.subr.mxu0 %v18_v1 }
   0x5   :  { %127 = vmatpush3.msra.mxu0 %v18_v1 }
   0x6   :  { %128 = vmatprep.subr.mxu0 %v17_v3 }
   0x7   :  { %129 = vmatpush3.msra.mxu0 %v17_v3 }
   0x8   :  { %130 = vmatprep.subr.mxu0 %v16_v4 }
   0x9   :  { %131 = vmatpush3.msra.mxu0 %v16_v4 }
   0xa   :  { %133 = vmatmul.mubr.msk.f32.vlgmr.msra.gmra.mxu0 %vm27_vm0, %v15_v5 }
  0xca   :  { %v134_v7 = vpop.f32.mrf.mxu0 }
  0xcb   :  { %v106_v8 = vadd.f32 %v134_v7, %v115_v6 }
  0xcc   :  { %v100_v9 = vpop.f32.mrf.mxu0 }
  0xcd   :  { %110 = vst.msk [vmem:[%s189_s3 + $0x8] sm:$0xff] %vm27_vm0, %v106_v8  ;;  %v101_v10 = vadd.f32 %v115_v6, %v100_v9 }
  0xcf   :  { %109 = vst.msk [vmem:[%s189_s3] sm:$0xff] %vm27_vm0, %v101_v10 }

// kernel: transformer_encoder_layer.9
= control target key start
LH: loop header
LB: loop body
LE: loop exit
PB: predicated region body
PF: predicated region fallthrough
CT: control target
= control target key end

     0   :  { %s515_s12 = smov 0   ;;  %s550_s0 = inlined_call_operand.vmem [shape: f32[8,8,8], index: 0, kind: input, shape index: {}]   ;;  %s551_s1 = inlined_call_operand.vmem [shape: f32[8,8,8], index: 1, kind: input, shape index: {}]   ;;  %s552_s2 = inlined_call_operand.vmem [shape: f32[8,8,8], index: 2, kind: input, shape index: {}]   ;;  %s553_s3 = inlined_call_operand.vmem [shape: f32[8,8,8], index: 3, kind: output, shape index: {}]  }
   0x1 LB: > { %s443_s13 = sadd.s32 4294967295, %s491_s12   ;;  %p447_p0 = scmp.ge.s32.totalorder %s491_s12, 1  ;;  %s491_s12 = sphi %s515_s12, %s13_s12  }
   0x2   : > { %p154_p1 = scmp.lt.s32.totalorder %s491_s12, 9 }
   0x4   : > { %p155_p2 = pnand %p447_p0, %p154_p1 }
   0x5   : > { %p184_p3 = scmp.lt.s32.totalorder (!%p155_p2), %s443_s13, 7 }
   0x6   : > { %158 = sbr.rel (%p155_p2) target bundleno = 720 (0x2d0), region = 32 }
   0xb   : > { %v493_v0 = vmov 0.0   ;;  %vm494_vm0 = vmmov 0   ;;  %s555_s13 = smov (!%p184_p3, %s443_s13), 7  ;;  %vm203_vm1 = vcmask 64512  }
   0xc   : > { %461 = vmatprep.subr.mxu0 %v493_v0  ;;  %463 = vmatprep.mubr.msk.f32.mxu0 %vm494_vm0, %v493_v0  ;;  %s523_s14 = sshll.u32 %s555_s13, 3 }
   0xd   : > { %466 = vmatprep.subr.mxu1 %v493_v0  ;;  %468 = vmatprep.mubr.msk.f32.mxu1 %vm494_vm0, %v493_v0  ;;  %s191_s17 = scalar_lea.vmem %s551_s1, %s523_s14  ;;  %s187_s20 = scalar_lea.vmem %s550_s0, %s523_s14 }
   0xe   : > { %v201_v1 = vld [vmem:[%s191_s17] sm:$0xff]  ;;  %s195_s23 = scalar_lea.vmem %s552_s2, %s523_s14  ;;  %s199_s26 = scalar_lea.vmem %s553_s3, %s523_s14 }
   0xf   : > { %462 = vmatpush3.xpose.msk.msra.mxu0 %vm203_vm1, %v201_v1  ;;  %v200_v2 = vld [vmem:[%s187_s20] sm:$0xff] }
  0x10   : > { %v202_v12 = vld [vmem:[%s195_s23] sm:$0xff] }
  0x11   : > { %467 = vmatpush3.msra.mxu1 %v202_v12 }
  0x12   : > { %464 = vmatmul.mubr.msk.f32.vlgmr.msra.gmra.mxu0 %vm203_vm1, %v200_v2 }
  0xd2   : > { %v276_v3 = vpop.f32.mrf.mxu0 }
  0xd3   : > { %v280_v4 = vmul.f32 0.35355338, %v276_v3 }
  0xd4   : > { %v465_v5 = vpop.f32.mrf.mxu0 }
  0xd5   : > { %v281_v6 = vsel %vm203_vm1, %v280_v4, -inf }
  0xd6   : > { %282 = vmax.xlane.f32.xlu0 %v281_v6 }
 0x15f   : > { %v283_v7 = vpop.xlane.xlu0 %282 }
 0x160   : > { %v284_v8 = vsub.f32 %v280_v4, %v283_v7 }
 0x162   : > { %v285_v9 = vmul.f32 1.442695, %v284_v8 }
 0x164   : > { %481 = vpow2.f32 %v285_v9 }
 0x171   : > { %v482_v10 = vpop.eup %481 }
 0x172   : > { %v287_v11 = vsel %vm203_vm1, %v482_v10, 0.0 }
 0x173   : > { %288 = vadd.xlane.f32.xlu0 %v287_v11 }
 0x1fc   : > { %v289_v13 = vpop.xlane.xlu0 %288 }
 0x1fd   : > { %483 = vrcp.f32 %v289_v13 }
 0x20a   : > { %v484_v14 = vpop.eup %483 }
 0x20b   : > { %v291_v15 = vmul.f32 %v484_v14, %v482_v10 }
 0x20d   : > { %469 = vmatmul.mubr.msk.f32.vlgmr.msra.gmra.mxu1 %vm203_vm1, %v291_v15 }
 0x2cd   : > { %v361_v16 = vpop.f32.mrf.mxu1 }
 0x2ce   : > { %365 = vst.msk [vmem:[%s199_s26] sm:$0xff] %vm203_vm1, %v361_v16 }
 0x2cf   : > { %v470_v17 = vpop.f32.mrf.mxu1 }
 0x2d0 PF: > { %s13_s12 = sadd.s32 1, %s491_s12  }
 0x2d1   : > { %p10_p4 = scmp.ge.s32.totalorder %s13_s12, 10  }
 0x2d3   :  { %12 = sbr.rel (!%p10_p4) target bundleno = 1 (0x1), region = 68 }

// kernel: transformer_encoder_layer.11
= control target key start
LH: loop header
LB: loop body
LE: loop exit
PB: predicated region body
PF: predicated region fallthrough
CT: control target
= control target key end

     0   :  { %vm23_vm0 = vcmask 261120   ;;  %s136_s0 = inlined_call_operand.vmem [shape: f32[16,32], index: 0, kind: input, shape index: {}]   ;;  %s137_s1 = inlined_call_operand.vmem [shape: f32[16,32], index: 1, kind: input, shape index: {}]   ;;  %s138_s2 = inlined_call_operand.vmem [shape: f32[1,32], index: 2, kind: input, shape index: {}]   ;;  %s139_s3 = inlined_call_operand.vmem [shape: f32[1,32], index: 3, kind: input, shape index: {}]   ;;  %s140_s4 = inlined_call_operand.vmem [shape: f32[16,32], index: 4, kind: output, shape index: {}]  }
   0x1   :  { %v17_v0 = vld [vmem:[%s136_s0] sm:$0xff]  ;;  %v18_v2 = vld [vmem:[%s136_s0 + $0x8] sm:$0xff] }
   0x2   :  { %v19_v1 = vld [vmem:[%s137_s1] sm:$0xff]  ;;  %v20_v4 = vld [vmem:[%s137_s1 + $0x8] sm:$0xff] }
   0x3   :  { %v21_v3 = vadd.f32 %v19_v1, %v17_v0  ;;  %v22_v5 = vadd.f32 %v20_v4, %v18_v2  ;;  %v75_v25 = vld [vmem:[%s138_s2] ss:$0 sm:$0xff] }
   0x4   :  { %v76_v27 = vld [vmem:[%s139_s3] ss:$0 sm:$0xff] }
   0x5   :  { %v24_v6 = vsel %vm23_vm0, %v21_v3, 0.0  ;;  %v27_v7 = vsel %vm23_vm0, %v22_v5, 0.0 }
   0x6   :  { %25 = vadd.xlane.f32.xlu0 %v24_v6 }
   0xa   :  { %28 = vadd.xlane.f32.xlu0 %v27_v7 }
  0x8f   :  { %v26_v8 = vpop.xlane.xlu0 %25 }
  0x90   :  { %v31_v9 = vmul.f32 0.03125, %v26_v8 }
  0x92   :  { %v33_v10 = vsub.f32 %v21_v3, %v31_v9 }
  0x93   :  { %v29_v11 = vpop.xlane.xlu0 %28 }
  0x94   :  { %v32_v12 = vmul.f32 0.03125, %v29_v11  ;;  %v35_v13 = vmul.f32 %v33_v10, %v33_v10 }
  0x96   :  { %v34_v14 = vsub.f32 %v22_v5, %v32_v12  ;;  %v37_v15 = vsel %vm23_vm0, %v35_v13, 0.0 }
  0x97   :  { %38 = vadd.xlane.f32.xlu1 %v37_v15 }
  0x98   :  { %v36_v16 = vmul.f32 %v34_v14, %v34_v14 }
  0x9a   :  { %v40_v17 = vsel %vm23_vm0, %v36_v16, 0.0 }
  0x9b   :  { %41 = vadd.xlane.f32.xlu1 %v40_v17 }
 0x120   :  { %v39_v18 = vpop.xlane.xlu1 %38 }
 0x121   :  { %v43_v19 = vmul.f32 0.03125, %v39_v18 }
 0x123   :  { %v45_v20 = vadd.f32 1e-05, %v43_v19 }
 0x124   :  { %v42_v21 = vpop.xlane.xlu1 %41 }
 0x125   :  { %77 = vrsqrt.f32 %v45_v20  ;;  %v44_v22 = vmul.f32 0.03125, %v42_v21 }
 0x127   :  { %v46_v23 = vadd.f32 1e-05, %v44_v22 }
 0x129   :  { %79 = vrsqrt.f32 %v46_v23 }
 0x132   :  { %v78_v24 = vpop.eup %77 }
 0x133   :  { %v49_v26 = vmul.f32 %v78_v24, %v33_v10 }
 0x135   :  { %v58_v28 = vmul.f32 %v75_v25, %v49_v26 }
 0x136   :  { %v80_v29 = vpop.eup %79 }
 0x137   :  { %v67_v30 = vadd.f32 %v76_v27, %v58_v28  ;;  %v50_v31 = vmul.f32 %v80_v29, %v34_v14 }
 0x139   :  { %69 = vst.msk [vmem:[%s140_s4] sm:$0xff] %vm23_vm0, %v67_v30  ;;  %v59_v32 = vmul.f32 %v75_v25, %v50_v31 }
 0x13b   :  { %v68_v33 = vadd.f32 %v76_v27, %v59_v32 }
 0x13d   :  { %70 = vst.msk [vmem:[%s140_s4 + $0x8] sm:$0xff] %vm23_vm0, %v68_v33 }

// kernel: transformer_encoder_layer.12
= control target key start
LH: loop header
LB: loop body
LE: loop exit
PB: predicated region body
PF: predicated region fallthrough
CT: control target
= control target key end

     0   :  { %vm27_vm0 = vcmask 261120   ;;  %vm111_vm1 = vcmask 523264   ;;  %s187_s1 = inlined_call_operand.vmem [shape: f32[32,64], index: 1, kind: input, shape index: {}]   ;;  %s188_s0 = inlined_call_operand.vmem [shape: f32[16,32], index: 0, kind: input, shape index: {}]   ;;  %s189_s2 = inlined_call_operand.vmem [shape: f32[1,64], index: 2, kind: input, shape index: {}]   ;;  %s190_s3 = inlined_call_operand.vmem [shape: f32[16,64], index: 3, kind: output, shape index: {}]  }
   0x1   :  { %v19_v0 = vld [vmem:[%s187_s1 + $0x18] sm:$0xff]  ;;  %v18_v1 = vld [vmem:[%s187_s1 + $0x10] sm:$0xff]  ;;  %v14_v2 = vld [vmem:[%s188_s0] sm:$0xff] }
   0x2   :  { %127 = vmatprep.subr.mxu0 %v19_v0  ;;  %v17_v3 = vld [vmem:[%s187_s1 + $0x8] sm:$0xff]  ;;  %135 = vmatprep.mubr.msk.f32.mxu0 %vm27_vm0, %v14_v2  ;;  %v16_v4 = vld [vmem:[%s187_s1] sm:$0xff] }
   0x3   :  { %128 = vmatpush3.msra.mxu0 %v19_v0  ;;  %v15_v5 = vld [vmem:[%s188_s0 + $0x8] sm:$0xff]  ;;  %v118_v6 = vld [vmem:[%s189_s2] ss:$0 sm:$0xff] }
   0x4   :  { %129 = vmatprep.subr.mxu0 %v18_v1 }
   0x5   :  { %130 = vmatpush3.msra.mxu0 %v18_v1 }
   0x6   :  { %131 = vmatprep.subr.mxu0 %v17_v3 }
   0x7   :  { %132 = vmatpush3.msra.mxu0 %v17_v3 }
   0x8   :  { %133 = vmatprep.subr.mxu0 %v16_v4 }
   0x9   :  { %134 = vmatpush3.msra.mxu0 %v16_v4 }
   0xa   :  { %136 = vmatmul.mubr.msk.f32.vlgmr.msra.gmra.mxu0 %vm27_vm0, %v15_v5 }
  0xca   :  { %v137_v7 = vpop.f32.mrf.mxu0 }
  0xcb   :  { %v106_v8 = vadd.f32 %v137_v7, %v118_v6 }
  0xcc   :  { %v100_v9 = vpop.f32.mrf.mxu0 }
  0xcd   :  { %v110_v10 = vmax.f32 %v106_v8, 0.0  ;;  %v101_v11 = vadd.f32 %v118_v6, %v100_v9 }
  0xcf   :  { %113 = vst.msk [vmem:[%s190_s3 + $0x8] sm:$0xff] %vm111_vm1, %v110_v10  ;;  %v109_v12 = vmax.f32 %v101_v11, 0.0 }
  0xd1   :  { %112 = vst.msk [vmem:[%s190_s3] sm:$0xff] %vm111_vm1, %v109_v12 }

// kernel: transformer_encoder_layer.13
= control target key start
LH: loop header
LB: loop body
LE: loop exit
PB: predicated region body
PF: predicated region fallthrough
CT: control target
= control target key end

     0   :  { %vm31_vm0 = vcmask 523264   ;;  %vm113_vm1 = vcmask 261120   ;;  %s213_s1 = inlined_call_operand.vmem [shape: f32[64,32], index: 1, kind: input, shape index: {}]   ;;  %s214_s0 = inlined_call_operand.vmem [shape: f32[16,64], index: 0, kind: input, shape index: {}]   ;;  %s215_s2 = inlined_call_operand.vmem [shape: f32[1,32], index: 2, kind: input, shape index: {}]   ;;  %s216_s3 = inlined_call_operand.vmem [shape: f32[16,32], index: 3, kind: output, shape index: {}]  }
   0x1   :  { %v23_v0 = vld [vmem:[%s213_s1 + $0x38] sm:$0xff]  ;;  %v22_v1 = vld [vmem:[%s213_s1 + $0x30] sm:$0xff]  ;;  %v21_v2 = vld [vmem:[%s213_s1 + $0x28] sm:$0xff] }
   0x2   :  { %133 = vmatprep.subr.mxu0 %v23_v0  ;;  %v14_v3 = vld [vmem:[%s214_s0] sm:$0xff]  ;;  %v19_v5 = vld [vmem:[%s213_s1 + $0x18] sm:$0xff]  ;;  %v18_v6 = vld [vmem:[%s213_s1 + $0x10] sm:$0xff] }
   0x3   :  { %134 = vmatpush3.msra.mxu0 %v23_v0  ;;  %149 = vmatprep.mubr.msk.f32.mxu0 %vm31_vm0, %v14_v3  ;;  %v20_v4 = vld [vmem:[%s213_s1 + $0x20] sm:$0xff]  ;;  %v17_v7 = vld [vmem:[%s213_s1 + $0x8] sm:$0xff] }
   0x4   :  { %135 = vmatprep.subr.mxu0 %v22_v1  ;;  %v16_v8 = vld [vmem:[%s213_s1] sm:$0xff]  ;;  %v15_v9 = vld [vmem:[%s214_s0 + $0x8] sm:$0xff] }
   0x5   :  { %136 = vmatpush3.msra.mxu0 %v22_v1  ;;  %v120_v10 = vld [vmem:[%s215_s2] ss:$0 sm:$0xff] }
   0x6   :  { %137 = vmatprep.subr.mxu0 %v21_v2 }
   0x7   :  { %138 = vmatpush3.msra.mxu0 %v21_v2 }
   0x8   :  { %139 = vmatprep.subr.mxu0 %v20_v4 }
   0x9   :  { %140 = vmatpush3.msra.mxu0 %v20_v4 }
   0xa   :  { %141 = vmatprep.subr.mxu0 %v19_v5 }
   0xb   :  { %142 = vmatpush3.msra.mxu0 %v19_v5 }
   0xc   :  { %143 = vmatprep.subr.mxu0 %v18_v6 }
   0xd   :  { %144 = vmatpush3.msra.mxu0 %v18_v6 }
   0xe   :  { %145 = vmatprep.subr.mxu0 %v17_v7 }
   0xf   :  { %146 = vmatpush3.msra.mxu0 %v17_v7 }
  0x10   :  { %147 = vmatprep.subr.mxu0 %v16_v8 }
  0x11   :  { %148 = vmatpush3.msra.mxu0 %v16_v8 }
  0x12   :  { %150 = vmatmul.mubr.msk.f32.vlgmr.msra.gmra.mxu0 %vm31_vm0, %v15_v9 }
  0xd2   :  { %v151_v11 = vpop.f32.mrf.mxu0 }
  0xd3   :  { %v110_v12 = vadd.f32 %v151_v11, %v120_v10 }
  0xd4   :  { %v104_v13 = vpop.f32.mrf.mxu0 }
  0xd5   :  { %115 = vst.msk [vmem:[%s216_s3 + $0x8] sm:$0xff] %vm113_vm1, %v110_v12  ;;  %v105_v14 = vadd.f32 %v120_v10, %v104_v13 }
  0xd7   :  { %114 = vst.msk [vmem:[%s216_s3] sm:$0xff] %vm113_vm1, %v105_v14 }

// kernel: transformer_encoder_layer.15
= control target key start
LH: loop header
LB: loop body
LE: loop exit
PB: predicated region body
PF: predicated region fallthrough
CT: control target
= control target key end

     0   :  { %vm31_vm0 = vcmask 261120   ;;  %s253_s0 = inlined_call_operand.vmem [shape: f32[16,32], index: 0, kind: input, shape index: {}]   ;;  %s254_s1 = inlined_call_operand.vmem [shape: f32[32,16], index: 1, kind: input, shape index: {}]   ;;  %s255_s2 = inlined_call_operand.vmem [shape: f32[1,16], index: 2, kind: input, shape index: {}]   ;;  %s256_s3 = inlined_call_operand.vmem [shape: f32[16,16], index: 3, kind: input, shape index: {}]   ;;  %s257_s4 = inlined_call_operand.hbm [shape: f32[16,32], index: 4, kind: output, shape index: {}]  }
   0x1   :  { %v23_v0 = vld [vmem:[%s254_s1 + $0x18] sm:$0xff]  ;;  %v22_v1 = vld [vmem:[%s254_s1 + $0x10] sm:$0xff]  ;;  %v18_v2 = vld [vmem:[%s253_s0] sm:$0xff] }
   0x2   :  { %153 = vmatprep.subr.mxu0 %v23_v0  ;;  %v21_v3 = vld [vmem:[%s254_s1 + $0x8] sm:$0xff]  ;;  %161 = vmatprep.mubr.msk.f32.mxu0 %vm31_vm0, %v18_v2  ;;  %v113_v4 = vld [vmem:[%s256_s3] sm:$0xff] }
   0x3   :  { %154 = vmatpush3.msra.mxu0 %v23_v0 }
   0x4   :  { %9 = vsyncpa [#allocation3], 0  ;;  %155 = vmatprep.subr.mxu0 %v22_v1  ;;  %s190_s25 = smov 16   ;;  %v20_v5 = vld [vmem:[%s254_s1] sm:$0xff]  ;;  %v114_v6 = vld [vmem:[%s256_s3 + $0x8] sm:$0xff]  ;;  %vm123_vm1 = vcmask 130048  }
   0x5   :  { %117 = vrot.lane.b32.xlu0 %v113_v4, %s190_s25  ;;  %156 = vmatpush3.msra.mxu0 %v22_v1  ;;  %v19_v7 = vld [vmem:[%s253_s0 + $0x8] sm:$0xff]  ;;  %v144_v9 = vld [vmem:[%s255_s2] ss:$0 sm:$0xff]  ;;  %s191_s1 = smov [#allocation2]  }
   0x6   :  { %157 = vmatprep.subr.mxu0 %v21_v3  ;;  %s133_s3 = sshll.u32 %s191_s1, 4  ;;  %s134_s3 = int_to_ptr.vmem [resolvable:$true] %s133_s3 }
   0x7   :  { %158 = vmatpush3.msra.mxu0 %v21_v3  ;;  %s168_s0 = scalar_lea.vmem %s134_s3, 256  ;;  %p173_p1 = scmp.lt.s32.totalorder %s134_s3, %s134_s3 }
   0x8   :  { %159 = vmatprep.subr.mxu0 %v20_v5  ;;  %p169_p0 = scmp.ne.s32.totalorder %s134_s3, %s168_s0  ;;  %p174_p2 = scmp.lt.s32.totalorder %s168_s0, %s168_s0 }
   0x9   :  { %119 = vrot.lane.b32.xlu0 %v114_v6, %s190_s25  ;;  %160 = vmatpush3.msra.mxu0 %v20_v5 }
   0xa   :  { %162 = vmatmul.mubr.msk.f32.vlgmr.msra.gmra.mxu0 %vm31_vm0, %v19_v7  ;;  %p175_p3 = por %p174_p2, %p173_p1 }
   0xc   :  { %p176_p4 = pnand %p175_p3, %p169_p0 }
  0x77   :  { %v118_v8 = vpop.permute.xlu0 %117 }
  0x7b   :  { %v120_v11 = vpop.permute.xlu0 %119 }
  0xca   :  { %v163_v10 = vpop.f32.mrf.mxu0 }
  0xcb   :  { %v110_v12 = vadd.f32 %v163_v10, %v144_v9 }
  0xcc   :  { %v104_v13 = vpop.f32.mrf.mxu0 }
  0xcd   :  { %v125_v14 = vsel %vm123_vm1, %v110_v12, %v120_v11  ;;  %v105_v15 = vadd.f32 %v144_v9, %v104_v13 }
  0xce   :  { %127 = vst.msk [vmem:[#allocation2 + $0x8] sm:$0xff] %vm31_vm0, %v125_v14 }
  0xcf   :  { %v124_v16 = vsel %vm123_vm1, %v105_v15, %v118_v8 }
  0xd0   :  { %126 = vst.msk [vmem:[#allocation2] sm:$0xff] %vm31_vm0, %v124_v16 }
  0xd1   :  { %179 = shalt.err (!%p176_p4)
}
  0xd2   :  { %s192_s2 = smov 128   ;;  %s193_s8 = smov 8  }
  0xd3   :  { %139 = dma.vmem_to_hbm [thread:$0]  %s134_s3, 256, %s257_s4, [#allocation3], %s192_s2, %s192_s2, %s193_s8  }
  0xd4   :  { %188 = dma.done.wait [#allocation3], 256  }
  0xd5   :  { %189 = vsyncadd [#allocation3], 4294967040 }
  0xd6   :  { %143 = vsyncpa [#allocation3], 1 }

</bundles_post_ra>
